<compile_context>
chip_gen: v7x
topology: tpu7x:2x2x1
jax: 0.10.0
libtpu: 0.0.40
codegen_flags: <defaults>
</compile_context>

<pallas_src>
from typing import NamedTuple

import jax
import jax.numpy as jnp
from jax.experimental import pallas as pl
from jax.experimental.pallas import tpu as pltpu

_LANES = 128
_SUBLANES = 8


class MixtureSameFamilyParams(NamedTuple):
    """JAX stand-in for the torch.distributions.MixtureSameFamily object."""
    mixture_logits: jax.Array    # [K]        Categorical logits (log normalized pi)
    mixture_probs: jax.Array     # [K]        Categorical probs  (normalized pi)
    component_loc: jax.Array     # [K, M, D]  Normal loc   (= mu, returned directly)
    component_scale: jax.Array   # [K, M, D]  Normal scale (= exp(sigma))


def _exp_kernel(x_ref, o_ref):
    # Single lane-dense tile: full-width vector loads/stores, exp on the EUP.
    o_ref[...] = jnp.exp(x_ref[...])


def _exp_lane_dense(x):
    """elementwise exp(x) via Pallas, reshaped to a lane-dense (rows, 128) slab."""
    orig_shape = x.shape
    flat = x.reshape(-1)
    n = flat.shape[0]

    # Small inputs: one minimal (8, 128) tile.  Large inputs: 256-row tiles
    # over a "parallel" grid axis (double-buffered DMA, 2 TCs on v7x).
    row_tile = _SUBLANES if n <= _SUBLANES * _LANES * 8 else 256
    block_elems = row_tile * _LANES
    n_pad = -(-n // block_elems) * block_elems
    if n_pad != n:
        flat = jnp.pad(flat, (0, n_pad - n))
    rows = n_pad // _LANES
    slab = flat.reshape(rows, _LANES)

    out = pl.pallas_call(
        _exp_kernel,
        grid=(rows // row_tile,),
        in_specs=[pl.BlockSpec((row_tile, _LANES), lambda i: (i, 0))],
        out_specs=pl.BlockSpec((row_tile, _LANES), lambda i: (i, 0)),
        out_shape=jax.ShapeDtypeStruct((rows, _LANES), x.dtype),
        compiler_params=pltpu.CompilerParams(
            dimension_semantics=("parallel",)),
    )(slab)

    return out.reshape(-1)[:n].reshape(orig_shape)


def mixture_same_family_forward(pi, mu, sigma):
    """pi: [K], mu: [K, M, D], sigma: [K, M, D]  ->  MixtureSameFamilyParams"""
    K, = pi.shape
    Kc, M, D = mu.shape
    assert Kc == K and sigma.shape == (K, M, D)
    # torch.distributions.MixtureSameFamily.__init__ requires the number of
    # mixture categories to match the last component batch dim.
    assert K == D, "MixtureSameFamily requires num_components == num_dimensions"

    # Categorical(pi): 8 floats -- plain jnp, left for XLA to fuse (perf review:
    # pushing these through padded vector tiles in the kernel is pure overhead).
    s = jnp.sum(pi)
    probs = pi / s
    logits = jnp.log(pi) - jnp.log(s)

    # Normal(mu, sigma.exp()): exp over K*M*D elements via the Pallas kernel,
    # lane-dense layout.  loc == mu is returned directly (no passthrough copy).
    scale = _exp_lane_dense(sigma)

    return MixtureSameFamilyParams(
        mixture_logits=logits,
        mixture_probs=probs,
        component_loc=mu,
        component_scale=scale,
    )


if __name__ == "__main__":
    # Deterministic parameter init mirroring the PyTorch __init__:
    #   pi    = ones(K) / K
    #   mu    = randn(K, M, D)
    #   sigma = ones(K, M, D)
    num_components = 8
    num_mixtures = 4
    num_dimensions = 8   # must equal num_components for a valid MixtureSameFamily

    key = jax.random.PRNGKey(0)
    pi = jnp.ones((num_components,), jnp.float32) / num_components
    mu = jax.random.normal(key, (num_components, num_mixtures, num_dimensions),
                           jnp.float32)
    sigma = jnp.ones((num_components, num_mixtures, num_dimensions), jnp.float32)

    out = mixture_same_family_forward(pi, mu, sigma)
    jax.block_until_ready(out)

    # Reference check in plain JAX.
    probs_ref = pi / jnp.sum(pi)
    assert jnp.allclose(out.mixture_probs, probs_ref, atol=1e-6)
    assert jnp.allclose(out.mixture_logits, jnp.log(probs_ref), atol=1e-6)
    assert jnp.allclose(out.component_loc, mu, atol=1e-6)
    assert jnp.allclose(out.component_scale, jnp.exp(sigma), rtol=1e-6)

    print("KERNEL_OK")
</pallas_src>

<mosaic_0001>
module attributes {stable_mosaic.version = 11 : i64} {
  func.func @_exp_kernel(%arg0: i32, %arg1: memref<8x128xf32, #tpu.memory_space<vmem>>, %arg2: memref<8x128xf32, #tpu.memory_space<vmem>>) attributes {dimension_semantics = [#tpu.dimension_semantics<parallel>], iteration_bounds = array<i64: 1>, scalar_prefetch = 0 : i64, scratch_operands = 0 : i64, tpu.core_type = #tpu.core_type<tc>, window_params = [{transform_indices = @transform_0, window_bounds = array<i64: 8, 128>}, {transform_indices = @transform_1, window_bounds = array<i64: 8, 128>}]} {
    %c0 = arith.constant 0 : index
    %c0_0 = arith.constant 0 : index
    %0 = vector.load %arg1[%c0, %c0_0] : memref<8x128xf32, #tpu.memory_space<vmem>>, vector<8x128xf32>
    %1 = math.exp %0 : vector<8x128xf32>
    %c0_1 = arith.constant 0 : index
    %c0_2 = arith.constant 0 : index
    %2 = vector.load %arg2[%c0_1, %c0_2] : memref<8x128xf32, #tpu.memory_space<vmem>>, vector<8x128xf32>
    tpu.vector_store %arg2[%c0_1, %c0_2], %1 {strides = array<i32>} : memref<8x128xf32, #tpu.memory_space<vmem>>, vector<8x128xf32>,
    return
  }
  func.func @transform_0(%arg0: i32) -> (i32, i32) {
    %c0_i32 = arith.constant 0 : i32
    %c0_i32_0 = arith.constant 0 : i32
    return %arg0, %c0_i32 : i32, i32
  }
  func.func @transform_1(%arg0: i32) -> (i32, i32) {
    %c0_i32 = arith.constant 0 : i32
    %c0_i32_0 = arith.constant 0 : i32
    return %arg0, %c0_i32 : i32, i32
  }
}

</mosaic_0001>

<bundles_post_ra>
// kernel: tpu_custom_call.1
= control target key start
LH: loop header
LB: loop body
LE: loop exit
PB: predicated region body
PF: predicated region fallthrough
CT: control target
= control target key end

     0   :  { %6 = vsyncpa [#allocation3], 0  ;;  %s128_s0 = inlined_call_operand.hbm [shape: f32[8,128], index: 0, kind: input, shape index: {}]   ;;  %s129_s1 = inlined_call_operand.hbm [shape: f32[8,128], index: 1, kind: output, shape index: {}]  }
   0x1   :  { %7 = vsyncpa [#allocation4], 0  ;;  %s92_s6 = smov [#allocation2]   ;;  %s44_s10 = scalar_lea.hbm %s128_s0, 128 }
   0x2   :  { %s14_s7 = sshll.u32 %s92_s6, 4  ;;  %p45_p0 = scmp.ne.s32.totalorder %s128_s0, %s44_s10  ;;  %s15_s7 = int_to_ptr.vmem [resolvable:$true] %s14_s7 }
   0x3   :  { %p48_p1 = scmp.lt.u32.totalorder %s44_s10, %s128_s0 }
   0x5   :  { %p50_p2 = pnand %p48_p1, %p45_p0 }
   0x7   :  { %53 = shalt.err (!%p50_p2)
}
   0x8   :  { %s54_s15 = scalar_lea.vmem %s15_s7, 128  ;;  %p59_p4 = scmp.lt.s32.totalorder %s15_s7, %s15_s7 }
   0x9   :  { %p55_p3 = scmp.ne.s32.totalorder %s15_s7, %s54_s15  ;;  %p60_p5 = scmp.lt.s32.totalorder %s54_s15, %s54_s15 }
   0xb   :  { %p61_p6 = por %p60_p5, %p59_p4 }
   0xd   :  { %p62_p7 = pnand %p61_p6, %p55_p3 }
   0xf   :  { %65 = shalt.err (!%p62_p7)
}
  0x10   :  { %17 = dma.hbm_to_vmem [thread:$0]  %s128_s0, 128, %s15_s7, [#allocation3]  }
  0x11   :  { %88 = dma.done.wait [#allocation3], 128  }
  0x12   :  { %89 = vsyncadd [#allocation3], 4294967168  ;;  %v21_v0 = vld [vmem:[#allocation2] sm:$0xff]  ;;  %s93_s18 = smov [#allocation5]  }
  0x13   :  { %v22_v1 = vmul.f32 1.442695, %v21_v0  ;;  %s31_s19 = sshll.u32 %s93_s18, 4  ;;  %s32_s19 = int_to_ptr.vmem [resolvable:$true] %s31_s19 }
  0x14   :  { %s66_s20 = scalar_lea.vmem %s32_s19, 128  ;;  %p71_p9 = scmp.lt.s32.totalorder %s32_s19, %s32_s19 }
  0x15   :  { %42 = vpow2.f32 %v22_v1  ;;  %p67_p8 = scmp.ne.s32.totalorder %s32_s19, %s66_s20  ;;  %p72_p10 = scmp.lt.s32.totalorder %s66_s20, %s66_s20 }
  0x17   :  { %p73_p11 = por %p72_p10, %p71_p9 }
  0x19   :  { %p74_p12 = pnand %p73_p11, %p67_p8 }
  0x1f   :  { %v43_v2 = vpop.eup %42 }
  0x20   :  { %24 = vst [vmem:[#allocation5] sm:$0xff] %v43_v2 }
  0x21   :  { %77 = shalt.err (!%p74_p12)
}
  0x22   :  { %s78_s0 = scalar_lea.hbm %s129_s1, 128 }
  0x23   :  { %p79_p13 = scmp.ne.s32.totalorder %s129_s1, %s78_s0  ;;  %p82_p0 = scmp.lt.u32.totalorder %s78_s0, %s129_s1 }
  0x25   :  { %p84_p1 = pnand %p82_p0, %p79_p13 }
  0x27   :  { %87 = shalt.err (!%p84_p1)
}
  0x28   :  { %34 = dma.vmem_to_hbm [thread:$0]  %s32_s19, 128, %s129_s1, [#allocation4]  }
  0x29   :  { %90 = dma.done.wait [#allocation4], 128  }
  0x2a   :  { %91 = vsyncadd [#allocation4], 4294967168 }
  0x2b   :  { %38 = vsyncpa [#allocation3], 1 }
  0x2c   :  { %39 = vsyncpa [#allocation4], 1 }

</bundles_post_ra>
